<compile_context>
chip_gen: v5e
topology: v5e:2x2
jax: 0.10.0
libtpu: 0.0.40
codegen_flags: <defaults>
</compile_context>

<pallas_src>
import jax
import jax.numpy as jnp
from jax import lax
from jax.experimental import pallas as pl
from jax.experimental.pallas import tpu as pltpu


def lstmm_kernel(q_ref, corr_ref, mask_ref, next_ref,
                 w_pre_ref, c_pre_ref, b_pre_ref, w_hh_ref,
                 w_hy_ref, w_hn_ref, b_head_ref,
                 y_out_ref, v_out_ref,
                 h_scr):
    B, TL, E = q_ref.shape
    f32 = jnp.float32
    bf16 = jnp.bfloat16

    # Fused pre-RNN projection: one (B*TL, E) @ (E, E) bf16 matmul (MXU).
    # corr was broadcast across all E lanes in torch, so its contribution is
    # rank-1: corr * c_pre instead of concat + a 2E-wide matmul.
    xp = jnp.dot(q_ref[...].reshape(B * TL, E), w_pre_ref[...],
                 preferred_element_type=f32).reshape(B, TL, E)
    xp = xp + corr_ref[...][:, :, None] * c_pre_ref[...] + b_pre_ref[...]
    h_scr[...] = xp  # holds x-projections; overwritten step-by-step with h_t

    # Elman RNN (tanh) over B steps; only h @ w_hh remains inside the loop.
    w_hh = w_hh_ref[...]  # bf16

    def step(t, h):
        h_new = jnp.tanh(h_scr[t]
                         + jnp.dot(h, w_hh, preferred_element_type=f32))
        h_scr[t] = h_new
        return h_new.astype(bf16)

    _ = lax.fori_loop(0, B, step, jnp.zeros((TL, E), bf16), unroll=True)

    # Vectorized epilogue: mask, fused (lin_layer @ lin_layer2) head, sigmoids.
    mask3 = mask_ref[...][:, :, None]          # (B, TL, 1)
    y_m = h_scr[...] * mask3                   # masked hidden states, f32
    n_m = next_ref[...] * mask3                # masked next-question embeddings

    yy = (jnp.sum(y_m * w_hy_ref[...], axis=-1)
          + jnp.sum(n_m * w_hn_ref[...], axis=-1)
          + b_head_ref[...])                   # (B, TL), b_head broadcasts
    y_out_ref[...] = jax.nn.sigmoid(yy)
    # single lane-dense store of the 2E-wide v output (concat only for store)
    v_out_ref[...] = jax.nn.sigmoid(jnp.concatenate([y_m, n_m], axis=-1))


def init_params(key, num_questions, embedding_dim, time_span):
    E = embedding_dim
    ks = jax.random.split(key, 8)

    def lin(k, fan_in, fan_out):
        kw, kb = jax.random.split(k)
        bound = 1.0 / jnp.sqrt(jnp.float32(fan_in))
        w = jax.random.uniform(kw, (fan_in, fan_out), jnp.float32, -bound, bound)
        b = jax.random.uniform(kb, (1, fan_out), jnp.float32, -bound, bound)
        return w, b  # stored as (in, out): forward computes x @ W + b

    q = jax.random.uniform(ks[0], (num_questions, E), jnp.float32)
    q = q / jnp.linalg.norm(q, axis=1, keepdims=True)  # F.normalize(dim=1)

    p = {"ques_emb": q}
    p["w_in"], p["b_in"] = lin(ks[1], 2 * E, E)      # input_layer
    p["w_l3"], p["b_l3"] = lin(ks[2], E, E)          # lin_layer3
    p["w_ih"], p["b_ih"] = lin(ks[3], E, E)          # RNN weight_ih / bias_ih
    p["w_hh"], p["b_hh"] = lin(ks[4], E, E)          # RNN weight_hh / bias_hh
    p["w_lin"], p["b_lin"] = lin(ks[5], 2 * E, E)    # lin_layer
    w2, b2 = lin(ks[6], E, 1)                        # lin_layer2
    p["w_l2"] = w2.reshape(1, E)
    p["b_l2"] = b2.reshape(1, 1)
    # time embedding exists in the module; its forward output is unused.
    p["time_emb"] = jax.random.normal(ks[7], (2 * time_span + 1, E), jnp.float32)
    return p


def _pick_l_tile(L):
    # The L axis is embarrassingly parallel.  A tile must divide L and be a
    # multiple of 128 (lane dim of the (B, L)-shaped operands/outputs) unless
    # it spans the whole axis — the (8, 128) BlockSpec rule.
    for cand in (512, 256, 128):
        if L % cand == 0:
            return cand
    return L


@jax.jit
def lstmm_forward(params, hist_ques, corr_seq, time, time2, nxt, corr):
    # time / time2 / corr only feed time_emb and get_subsequent_mask, whose
    # results never reach the torch forward's outputs -> dead in eval.
    del time, time2, corr
    B, L = hist_ques.shape
    E = params["ques_emb"].shape[1]
    f32 = jnp.float32
    bf16 = jnp.bfloat16

    # ---- exact (eval-mode) parameter fusion, constant-folded under jit ----
    w_chain = params["w_in"] @ params["w_l3"] @ params["w_ih"]        # (2E, E)
    w_pre = w_chain[:E].astype(bf16)                                  # q_emb path
    c_pre = jnp.sum(w_chain[E:], axis=0, keepdims=True)               # corr rank-1
    b_pre = ((params["b_in"] @ params["w_l3"] + params["b_l3"]) @ params["w_ih"]
             + params["b_ih"] + params["b_hh"])                       # (1, E)
    w_l2_col = params["w_l2"].reshape(E, 1)
    w_head = params["w_lin"] @ w_l2_col                               # (2E, 1)
    w_hy = w_head[:E].reshape(1, E)
    w_hn = w_head[E:].reshape(1, E)
    b_head = params["b_lin"] @ w_l2_col + params["b_l2"]              # (1, 1)
    w_hh = params["w_hh"].astype(bf16)

    # ---- glue: embedding gathers + mask (plain JAX) ----
    q_emb = params["ques_emb"][hist_ques].astype(bf16)   # matmul operand only
    next_emb = params["ques_emb"][nxt]                   # elementwise use: f32
    mask = (hist_ques != 0).astype(f32)
    corr_f = corr_seq.astype(f32)

    TL = _pick_l_tile(L)
    grid = (L // TL,)

    io3 = lambda: pl.BlockSpec((B, TL, E), lambda j: (0, j, 0))
    io2 = lambda: pl.BlockSpec((B, TL), lambda j: (0, j))
    full = lambda shape: pl.BlockSpec(shape, lambda j, s=shape: tuple(0 for _ in s))

    y, v = pl.pallas_call(
        lstmm_kernel,
        out_shape=(jax.ShapeDtypeStruct((B, L), f32),
                   jax.ShapeDtypeStruct((B, L, 2 * E), f32)),
        grid_spec=pltpu.PrefetchScalarGridSpec(
            num_scalar_prefetch=0,
            grid=grid,
            in_specs=[io3(), io2(), io2(), io3(),
                      full((E, E)), full((1, E)), full((1, E)), full((E, E)),
                      full((1, E)), full((1, E)), full((1, 1))],
            out_specs=(io2(),
                       pl.BlockSpec((B, TL, 2 * E), lambda j: (0, j, 0))),
            scratch_shapes=[pltpu.VMEM((B, TL, E), f32)]),
        compiler_params=pltpu.CompilerParams(
            dimension_semantics=("parallel",),
            vmem_limit_bytes=64 * 1024 * 1024),
    )(q_emb, corr_f, mask, next_emb,
      w_pre, c_pre, b_pre, w_hh, w_hy, w_hn, b_head)

    return y[..., None], v


def ref_forward(params, hist_ques, corr_seq, nxt):
    """Pure-JAX f32 reference replicating the torch forward (eval mode)."""
    B, L = hist_ques.shape
    E = params["ques_emb"].shape[1]
    q_emb = params["ques_emb"][hist_ques]
    next_emb = params["ques_emb"][nxt]
    mask = (hist_ques != 0).astype(jnp.float32)[:, :, None]
    corr_b = jnp.broadcast_to(corr_seq.astype(jnp.float32)[:, :, None], (B, L, E))
    qc = jnp.concatenate([q_emb, corr_b], axis=-1)
    x = qc @ params["w_in"] + params["b_in"]
    x = x @ params["w_l3"] + params["b_l3"]
    h = jnp.zeros((L, E), jnp.float32)
    ys = []
    for t in range(B):
        h = jnp.tanh(x[t] @ params["w_ih"] + params["b_ih"]
                     + h @ params["w_hh"] + params["b_hh"])
        ys.append(h)
    y = jnp.stack(ys, axis=0) * mask
    v = jnp.concatenate([y, next_emb], axis=-1) * mask
    yy = v @ params["w_lin"] + params["b_lin"]
    yy = jnp.sum(yy * params["w_l2"], axis=-1, keepdims=True) + params["b_l2"][0]
    return jax.nn.sigmoid(yy), jax.nn.sigmoid(v)


if __name__ == "__main__":
    B, L, E, NQ, TS = 4, 8, 32, 16, 4  # batch, max_len, embedding_dim, num_questions, time_span

    params = init_params(jax.random.PRNGKey(0), NQ, E, TS)

    k1, k2, k3, k4 = jax.random.split(jax.random.PRNGKey(0), 4)
    hist_ques = jax.random.randint(k1, (B, L), 0, NQ)
    corr_seq = jax.random.randint(k2, (B, L), 0, 2)
    nxt = jax.random.randint(k3, (B, L), 0, NQ)
    time = jax.random.randint(k4, (B, L), 0, 2 * TS + 1)
    time2 = time
    corr = corr_seq

    y, v = lstmm_forward(params, hist_ques, corr_seq, time, time2, nxt, corr)
    jax.block_until_ready((y, v))

    y_ref, v_ref = ref_forward(params, hist_ques, corr_seq, nxt)
    assert y.shape == (B, L, 1) and v.shape == (B, L, 2 * E)
    # bf16 MXU operands -> compare against the f32 reference with a loose atol.
    assert jnp.allclose(y, y_ref, atol=2e-2, rtol=0), "y mismatch vs reference"
    assert jnp.allclose(v, v_ref, atol=2e-2, rtol=0), "v mismatch vs reference"

    print("KERNEL_OK")
</pallas_src>

<mosaic_0001>
module attributes {stable_mosaic.version = 11 : i64} {
  func.func @lstmm_kernel(%arg0: i32, %arg1: memref<4x8x32xbf16, #tpu.memory_space<vmem>>, %arg2: memref<4x8xf32, #tpu.memory_space<vmem>>, %arg3: memref<4x8xf32, #tpu.memory_space<vmem>>, %arg4: memref<4x8x32xf32, #tpu.memory_space<vmem>>, %arg5: memref<32x32xbf16, #tpu.memory_space<vmem>>, %arg6: memref<1x32xf32, #tpu.memory_space<vmem>>, %arg7: memref<1x32xf32, #tpu.memory_space<vmem>>, %arg8: memref<32x32xbf16, #tpu.memory_space<vmem>>, %arg9: memref<1x32xf32, #tpu.memory_space<vmem>>, %arg10: memref<1x32xf32, #tpu.memory_space<vmem>>, %arg11: memref<1x1xf32, #tpu.memory_space<vmem>>, %arg12: memref<4x8xf32, #tpu.memory_space<vmem>>, %arg13: memref<4x8x64xf32, #tpu.memory_space<vmem>>, %arg14: memref<4x8x32xf32, #tpu.memory_space<vmem>>) attributes {dimension_semantics = [#tpu.dimension_semantics<parallel>], iteration_bounds = array<i64: 1>, scalar_prefetch = 0 : i64, scratch_operands = 1 : i64, tpu.core_type = #tpu.core_type<tc>, window_params = [{transform_indices = @transform_0, window_bounds = array<i64: 4, 8, 32>}, {transform_indices = @transform_1, window_bounds = array<i64: 4, 8>}, {transform_indices = @transform_2, window_bounds = array<i64: 4, 8>}, {transform_indices = @transform_3, window_bounds = array<i64: 4, 8, 32>}, {pipeline_mode = #tpu.pipeline_mode<synchronous>, transform_indices = @transform_4, window_bounds = array<i64: 32, 32>}, {pipeline_mode = #tpu.pipeline_mode<synchronous>, transform_indices = @transform_5, window_bounds = array<i64: 1, 32>}, {pipeline_mode = #tpu.pipeline_mode<synchronous>, transform_indices = @transform_6, window_bounds = array<i64: 1, 32>}, {pipeline_mode = #tpu.pipeline_mode<synchronous>, transform_indices = @transform_7, window_bounds = array<i64: 32, 32>}, {pipeline_mode = #tpu.pipeline_mode<synchronous>, transform_indices = @transform_8, window_bounds = array<i64: 1, 32>}, {pipeline_mode = #tpu.pipeline_mode<synchronous>, transform_indices = @transform_9, window_bounds = array<i64: 1, 32>}, {pipeline_mode = #tpu.pipeline_mode<synchronous>, transform_indices = @transform_10, window_bounds = array<i64: 1, 1>}, {transform_indices = @transform_11, window_bounds = array<i64: 4, 8>}, {transform_indices = @transform_12, window_bounds = array<i64: 4, 8, 64>}]} {
    %c0 = arith.constant 0 : index
    %c0_0 = arith.constant 0 : index
    %c0_1 = arith.constant 0 : index
    %0 = vector.load %arg1[%c0, %c0_0, %c0_1] : memref<4x8x32xbf16, #tpu.memory_space<vmem>>, vector<4x8x32xbf16>
    %1 = vector.shape_cast %0 : vector<4x8x32xbf16> to vector<32x32xbf16>
    %c0_2 = arith.constant 0 : index
    %c0_3 = arith.constant 0 : index
    %2 = vector.load %arg5[%c0_2, %c0_3] : memref<32x32xbf16, #tpu.memory_space<vmem>>, vector<32x32xbf16>
    %cst = arith.constant dense<0.000000e+00> : vector<32x32xf32>
    %3 = tpu.matmul %1, %2, %cst {dimension_numbers = #tpu.dot_dimension_numbers<[1], [0], [0], [1], [0, 0, 1, 1], [], []>} : vector<32x32xbf16>, vector<32x32xbf16>, vector<32x32xf32> -> vector<32x32xf32>
    %4 = vector.shape_cast %3 : vector<32x32xf32> to vector<4x8x32xf32>
    %c0_4 = arith.constant 0 : index
    %c0_5 = arith.constant 0 : index
    %5 = vector.load %arg2[%c0_4, %c0_5] : memref<4x8xf32, #tpu.memory_space<vmem>>, vector<4x8xf32>
    %6 = vector.shape_cast %5 : vector<4x8xf32> to vector<4x8x1xf32>
    %c0_6 = arith.constant 0 : index
    %c0_7 = arith.constant 0 : index
    %7 = vector.load %arg6[%c0_6, %c0_7] : memref<1x32xf32, #tpu.memory_space<vmem>>, vector<1x32xf32>
    %8 = vector.shape_cast %7 : vector<1x32xf32> to vector<1x1x32xf32>
    %9 = vector.broadcast %6 : vector<4x8x1xf32> to vector<4x8x32xf32>
    %10 = vector.broadcast %8 : vector<1x1x32xf32> to vector<4x8x32xf32>
    %11 = arith.mulf %9, %10 : vector<4x8x32xf32>
    %12 = arith.addf %4, %11 : vector<4x8x32xf32>
    %c0_8 = arith.constant 0 : index
    %c0_9 = arith.constant 0 : index
    %13 = vector.load %arg7[%c0_8, %c0_9] : memref<1x32xf32, #tpu.memory_space<vmem>>, vector<1x32xf32>
    %14 = vector.shape_cast %13 : vector<1x32xf32> to vector<1x1x32xf32>
    %15 = vector.broadcast %14 : vector<1x1x32xf32> to vector<4x8x32xf32>
    %16 = arith.addf %12, %15 : vector<4x8x32xf32>
    %c0_10 = arith.constant 0 : index
    %c0_11 = arith.constant 0 : index
    %c0_12 = arith.constant 0 : index
    %17 = vector.load %arg14[%c0_10, %c0_11, %c0_12] : memref<4x8x32xf32, #tpu.memory_space<vmem>>, vector<4x8x32xf32>
    tpu.vector_store %arg14[%c0_10, %c0_11, %c0_12], %16 {strides = array<i32>} : memref<4x8x32xf32, #tpu.memory_space<vmem>>, vector<4x8x32xf32>,
    %c0_13 = arith.constant 0 : index
    %c0_14 = arith.constant 0 : index
    %18 = vector.load %arg8[%c0_13, %c0_14] : memref<32x32xbf16, #tpu.memory_space<vmem>>, vector<32x32xbf16>
    %cst_15 = arith.constant 0.000000e+00 : bf16
    %19 = vector.broadcast %cst_15 : bf16 to vector<8x32xbf16>
    %c0_i32 = arith.constant 0 : i32
    %20 = arith.index_cast %c0_i32 : i32 to index
    %c0_16 = arith.constant 0 : index
    %c0_17 = arith.constant 0 : index
    %21 = vector.load %arg14[%20, %c0_16, %c0_17] : memref<4x8x32xf32, #tpu.memory_space<vmem>>, vector<1x8x32xf32>
    %22 = vector.shape_cast %21 : vector<1x8x32xf32> to vector<8x32xf32>
    %cst_18 = arith.constant dense<0.000000e+00> : vector<8x32xf32>
    %23 = tpu.matmul %19, %18, %cst_18 {dimension_numbers = #tpu.dot_dimension_numbers<[1], [0], [0], [1], [0, 0, 1, 1], [], []>} : vector<8x32xbf16>, vector<32x32xbf16>, vector<8x32xf32> -> vector<8x32xf32>
    %24 = arith.addf %22, %23 : vector<8x32xf32>
    %25 = math.tanh %24 : vector<8x32xf32>
    %26 = arith.index_cast %c0_i32 : i32 to index
    %c0_19 = arith.constant 0 : index
    %c0_20 = arith.constant 0 : index
    %27 = vector.load %arg14[%26, %c0_19, %c0_20] : memref<4x8x32xf32, #tpu.memory_space<vmem>>, vector<1x8x32xf32>
    %28 = vector.shape_cast %27 : vector<1x8x32xf32> to vector<8x32xf32>
    %29 = vector.shape_cast %25 : vector<8x32xf32> to vector<1x8x32xf32>
    tpu.vector_store %arg14[%26, %c0_19, %c0_20], %29 {strides = array<i32>} : memref<4x8x32xf32, #tpu.memory_space<vmem>>, vector<1x8x32xf32>,
    %30 = arith.truncf %25 : vector<8x32xf32> to vector<8x32xbf16>
    %c1_i32 = arith.constant 1 : i32
    %31 = arith.index_cast %c1_i32 : i32 to index
    %c0_21 = arith.constant 0 : index
    %c0_22 = arith.constant 0 : index
    %32 = vector.load %arg14[%31, %c0_21, %c0_22] : memref<4x8x32xf32, #tpu.memory_space<vmem>>, vector<1x8x32xf32>
    %33 = vector.shape_cast %32 : vector<1x8x32xf32> to vector<8x32xf32>
    %cst_23 = arith.constant dense<0.000000e+00> : vector<8x32xf32>
    %34 = tpu.matmul %30, %18, %cst_23 {dimension_numbers = #tpu.dot_dimension_numbers<[1], [0], [0], [1], [0, 0, 1, 1], [], []>} : vector<8x32xbf16>, vector<32x32xbf16>, vector<8x32xf32> -> vector<8x32xf32>
    %35 = arith.addf %33, %34 : vector<8x32xf32>
    %36 = math.tanh %35 : vector<8x32xf32>
    %37 = arith.index_cast %c1_i32 : i32 to index
    %c0_24 = arith.constant 0 : index
    %c0_25 = arith.constant 0 : index
    %38 = vector.load %arg14[%37, %c0_24, %c0_25] : memref<4x8x32xf32, #tpu.memory_space<vmem>>, vector<1x8x32xf32>
    %39 = vector.shape_cast %38 : vector<1x8x32xf32> to vector<8x32xf32>
    %40 = vector.shape_cast %36 : vector<8x32xf32> to vector<1x8x32xf32>
    tpu.vector_store %arg14[%37, %c0_24, %c0_25], %40 {strides = array<i32>} : memref<4x8x32xf32, #tpu.memory_space<vmem>>, vector<1x8x32xf32>,
    %41 = arith.truncf %36 : vector<8x32xf32> to vector<8x32xbf16>
    %c2_i32 = arith.constant 2 : i32
    %42 = arith.index_cast %c2_i32 : i32 to index
    %c0_26 = arith.constant 0 : index
    %c0_27 = arith.constant 0 : index
    %43 = vector.load %arg14[%42, %c0_26, %c0_27] : memref<4x8x32xf32, #tpu.memory_space<vmem>>, vector<1x8x32xf32>
    %44 = vector.shape_cast %43 : vector<1x8x32xf32> to vector<8x32xf32>
    %cst_28 = arith.constant dense<0.000000e+00> : vector<8x32xf32>
    %45 = tpu.matmul %41, %18, %cst_28 {dimension_numbers = #tpu.dot_dimension_numbers<[1], [0], [0], [1], [0, 0, 1, 1], [], []>} : vector<8x32xbf16>, vector<32x32xbf16>, vector<8x32xf32> -> vector<8x32xf32>
    %46 = arith.addf %44, %45 : vector<8x32xf32>
    %47 = math.tanh %46 : vector<8x32xf32>
    %48 = arith.index_cast %c2_i32 : i32 to index
    %c0_29 = arith.constant 0 : index
    %c0_30 = arith.constant 0 : index
    %49 = vector.load %arg14[%48, %c0_29, %c0_30] : memref<4x8x32xf32, #tpu.memory_space<vmem>>, vector<1x8x32xf32>
    %50 = vector.shape_cast %49 : vector<1x8x32xf32> to vector<8x32xf32>
    %51 = vector.shape_cast %47 : vector<8x32xf32> to vector<1x8x32xf32>
    tpu.vector_store %arg14[%48, %c0_29, %c0_30], %51 {strides = array<i32>} : memref<4x8x32xf32, #tpu.memory_space<vmem>>, vector<1x8x32xf32>,
    %52 = arith.truncf %47 : vector<8x32xf32> to vector<8x32xbf16>
    %c3_i32 = arith.constant 3 : i32
    %53 = arith.index_cast %c3_i32 : i32 to index
    %c0_31 = arith.constant 0 : index
    %c0_32 = arith.constant 0 : index
    %54 = vector.load %arg14[%53, %c0_31, %c0_32] : memref<4x8x32xf32, #tpu.memory_space<vmem>>, vector<1x8x32xf32>
    %55 = vector.shape_cast %54 : vector<1x8x32xf32> to vector<8x32xf32>
    %cst_33 = arith.constant dense<0.000000e+00> : vector<8x32xf32>
    %56 = tpu.matmul %52, %18, %cst_33 {dimension_numbers = #tpu.dot_dimension_numbers<[1], [0], [0], [1], [0, 0, 1, 1], [], []>} : vector<8x32xbf16>, vector<32x32xbf16>, vector<8x32xf32> -> vector<8x32xf32>
    %57 = arith.addf %55, %56 : vector<8x32xf32>
    %58 = math.tanh %57 : vector<8x32xf32>
    %59 = arith.index_cast %c3_i32 : i32 to index
    %c0_34 = arith.constant 0 : index
    %c0_35 = arith.constant 0 : index
    %60 = vector.load %arg14[%59, %c0_34, %c0_35] : memref<4x8x32xf32, #tpu.memory_space<vmem>>, vector<1x8x32xf32>
    %61 = vector.shape_cast %60 : vector<1x8x32xf32> to vector<8x32xf32>
    %62 = vector.shape_cast %58 : vector<8x32xf32> to vector<1x8x32xf32>
    tpu.vector_store %arg14[%59, %c0_34, %c0_35], %62 {strides = array<i32>} : memref<4x8x32xf32, #tpu.memory_space<vmem>>, vector<1x8x32xf32>,
    %63 = arith.truncf %58 : vector<8x32xf32> to vector<8x32xbf16>
    %c4_i32 = arith.constant 4 : i32
    %c0_36 = arith.constant 0 : index
    %c0_37 = arith.constant 0 : index
    %64 = vector.load %arg3[%c0_36, %c0_37] : memref<4x8xf32, #tpu.memory_space<vmem>>, vector<4x8xf32>
    %65 = vector.shape_cast %64 : vector<4x8xf32> to vector<4x8x1xf32>
    %c0_38 = arith.constant 0 : index
    %c0_39 = arith.constant 0 : index
    %c0_40 = arith.constant 0 : index
    %66 = vector.load %arg14[%c0_38, %c0_39, %c0_40] : memref<4x8x32xf32, #tpu.memory_space<vmem>>, vector<4x8x32xf32>
    %67 = vector.broadcast %65 : vector<4x8x1xf32> to vector<4x8x32xf32>
    %68 = arith.mulf %66, %67 : vector<4x8x32xf32>
    %c0_41 = arith.constant 0 : index
    %c0_42 = arith.constant 0 : index
    %c0_43 = arith.constant 0 : index
    %69 = vector.load %arg4[%c0_41, %c0_42, %c0_43] : memref<4x8x32xf32, #tpu.memory_space<vmem>>, vector<4x8x32xf32>
    %70 = vector.broadcast %65 : vector<4x8x1xf32> to vector<4x8x32xf32>
    %71 = arith.mulf %69, %70 : vector<4x8x32xf32>
    %c0_44 = arith.constant 0 : index
    %c0_45 = arith.constant 0 : index
    %72 = vector.load %arg9[%c0_44, %c0_45] : memref<1x32xf32, #tpu.memory_space<vmem>>, vector<1x32xf32>
    %73 = vector.shape_cast %72 : vector<1x32xf32> to vector<1x1x32xf32>
    %74 = vector.broadcast %73 : vector<1x1x32xf32> to vector<4x8x32xf32>
    %75 = arith.mulf %68, %74 : vector<4x8x32xf32>
    %cst_46 = arith.constant dense<0.000000e+00> : vector<4x8xf32>
    %76 = vector.multi_reduction <add>, %75, %cst_46 [2] : vector<4x8x32xf32> to vector<4x8xf32>
    %c0_47 = arith.constant 0 : index
    %c0_48 = arith.constant 0 : index
    %77 = vector.load %arg10[%c0_47, %c0_48] : memref<1x32xf32, #tpu.memory_space<vmem>>, vector<1x32xf32>
    %78 = vector.shape_cast %77 : vector<1x32xf32> to vector<1x1x32xf32>
    %79 = vector.broadcast %78 : vector<1x1x32xf32> to vector<4x8x32xf32>
    %80 = arith.mulf %71, %79 : vector<4x8x32xf32>
    %cst_49 = arith.constant dense<0.000000e+00> : vector<4x8xf32>
    %81 = vector.multi_reduction <add>, %80, %cst_49 [2] : vector<4x8x32xf32> to vector<4x8xf32>
    %82 = arith.addf %76, %81 : vector<4x8xf32>
    %c0_50 = arith.constant 0 : index
    %c0_51 = arith.constant 0 : index
    %83 = vector.load %arg11[%c0_50, %c0_51] : memref<1x1xf32, #tpu.memory_space<vmem>>, vector<1x1xf32>
    %84 = vector.broadcast %83 : vector<1x1xf32> to vector<4x8xf32>
    %85 = arith.addf %82, %84 : vector<4x8xf32>
    %86 = arith.negf %85 : vector<4x8xf32>
    %87 = math.exp %86 : vector<4x8xf32>
    %cst_52 = arith.constant 1.000000e+00 : f32
    %88 = vector.broadcast %cst_52 : f32 to vector<4x8xf32>
    %89 = arith.addf %88, %87 : vector<4x8xf32>
    %90 = arith.divf %88, %89 : vector<4x8xf32>
    %c0_53 = arith.constant 0 : index
    %c0_54 = arith.constant 0 : index
    %91 = vector.load %arg12[%c0_53, %c0_54] : memref<4x8xf32, #tpu.memory_space<vmem>>, vector<4x8xf32>
    tpu.vector_store %arg12[%c0_53, %c0_54], %90 {strides = array<i32>} : memref<4x8xf32, #tpu.memory_space<vmem>>, vector<4x8xf32>,
    %92 = tpu.concatenate %68, %71 in 2 : vector<4x8x32xf32>, vector<4x8x32xf32> -> vector<4x8x64xf32>
    %93 = arith.negf %92 : vector<4x8x64xf32>
    %94 = math.exp %93 : vector<4x8x64xf32>
    %cst_55 = arith.constant 1.000000e+00 : f32
    %95 = vector.broadcast %cst_55 : f32 to vector<4x8x64xf32>
    %96 = arith.addf %95, %94 : vector<4x8x64xf32>
    %97 = arith.divf %95, %96 : vector<4x8x64xf32>
    %c0_56 = arith.constant 0 : index
    %c0_57 = arith.constant 0 : index
    %c0_58 = arith.constant 0 : index
    %98 = vector.load %arg13[%c0_56, %c0_57, %c0_58] : memref<4x8x64xf32, #tpu.memory_space<vmem>>, vector<4x8x64xf32>
    tpu.vector_store %arg13[%c0_56, %c0_57, %c0_58], %97 {strides = array<i32>} : memref<4x8x64xf32, #tpu.memory_space<vmem>>, vector<4x8x64xf32>,
    return
  }
  func.func @transform_0(%arg0: i32) -> (i32, i32, i32) {
    %c0_i32 = arith.constant 0 : i32
    %c0_i32_0 = arith.constant 0 : i32
    %c0_i32_1 = arith.constant 0 : i32
    return %c0_i32, %arg0, %c0_i32_0 : i32, i32, i32
  }
  func.func @transform_1(%arg0: i32) -> (i32, i32) {
    %c0_i32 = arith.constant 0 : i32
    %c0_i32_0 = arith.constant 0 : i32
    return %c0_i32, %arg0 : i32, i32
  }
  func.func @transform_2(%arg0: i32) -> (i32, i32) {
    %c0_i32 = arith.constant 0 : i32
    %c0_i32_0 = arith.constant 0 : i32
    return %c0_i32, %arg0 : i32, i32
  }
  func.func @transform_3(%arg0: i32) -> (i32, i32, i32) {
    %c0_i32 = arith.constant 0 : i32
    %c0_i32_0 = arith.constant 0 : i32
    %c0_i32_1 = arith.constant 0 : i32
    return %c0_i32, %arg0, %c0_i32_0 : i32, i32, i32
  }
  func.func @transform_4(%arg0: i32) -> (i32, i32) {
    %c0_i32 = arith.constant 0 : i32
    %c0_i32_0 = arith.constant 0 : i32
    %c0_i32_1 = arith.constant 0 : i32
    return %c0_i32, %c0_i32_0 : i32, i32
  }
  func.func @transform_5(%arg0: i32) -> (i32, i32) {
    %c0_i32 = arith.constant 0 : i32
    %c0_i32_0 = arith.constant 0 : i32
    %c0_i32_1 = arith.constant 0 : i32
    return %c0_i32, %c0_i32_0 : i32, i32
  }
  func.func @transform_6(%arg0: i32) -> (i32, i32) {
    %c0_i32 = arith.constant 0 : i32
    %c0_i32_0 = arith.constant 0 : i32
    %c0_i32_1 = arith.constant 0 : i32
    return %c0_i32, %c0_i32_0 : i32, i32
  }
  func.func @transform_7(%arg0: i32) -> (i32, i32) {
    %c0_i32 = arith.constant 0 : i32
    %c0_i32_0 = arith.constant 0 : i32
    %c0_i32_1 = arith.constant 0 : i32
    return %c0_i32, %c0_i32_0 : i32, i32
  }
  func.func @transform_8(%arg0: i32) -> (i32, i32) {
    %c0_i32 = arith.constant 0 : i32
    %c0_i32_0 = arith.constant 0 : i32
    %c0_i32_1 = arith.constant 0 : i32
    return %c0_i32, %c0_i32_0 : i32, i32
  }
  func.func @transform_9(%arg0: i32) -> (i32, i32) {
    %c0_i32 = arith.constant 0 : i32
    %c0_i32_0 = arith.constant 0 : i32
    %c0_i32_1 = arith.constant 0 : i32
    return %c0_i32, %c0_i32_0 : i32, i32
  }
  func.func @transform_10(%arg0: i32) -> (i32, i32) {
    %c0_i32 = arith.constant 0 : i32
    %c0_i32_0 = arith.constant 0 : i32
    %c0_i32_1 = arith.constant 0 : i32
    return %c0_i32, %c0_i32_0 : i32, i32
  }
  func.func @transform_11(%arg0: i32) -> (i32, i32) {
    %c0_i32 = arith.constant 0 : i32
    %c0_i32_0 = arith.constant 0 : i32
    return %c0_i32, %arg0 : i32, i32
  }
  func.func @transform_12(%arg0: i32) -> (i32, i32, i32) {
    %c0_i32 = arith.constant 0 : i32
    %c0_i32_0 = arith.constant 0 : i32
    %c0_i32_1 = arith.constant 0 : i32
    return %c0_i32, %arg0, %c0_i32_0 : i32, i32, i32
  }
}

</mosaic_0001>

<bundles_post_ra>
// kernel: lstmm_forward.1
= control target key start
LH: loop header
LB: loop body
LE: loop exit
PB: predicated region body
PF: predicated region fallthrough
CT: control target
= control target key end

     0   :  { %s962_s0 = inlined_call_operand.vmem [shape: bf16[4,8,32], index: 0, kind: input, shape index: {}]   ;;  %s963_s1 = inlined_call_operand.vmem [shape: f32[4,8], index: 1, kind: input, shape index: {}]   ;;  %s964_s2 = inlined_call_operand.vmem [shape: f32[4,8], index: 2, kind: input, shape index: {}]   ;;  %s965_s3 = inlined_call_operand.vmem [shape: f32[4,8,32], index: 3, kind: input, shape index: {}]   ;;  %s966_s4 = inlined_call_operand.vmem [shape: bf16[32,32], index: 4, kind: input, shape index: {}]   ;;  %s967_s5 = inlined_call_operand.vmem [shape: f32[1,32], index: 5, kind: input, shape index: {}]   ;;  %s968_s6 = inlined_call_operand.vmem [shape: f32[1,32], index: 6, kind: input, shape index: {}]   ;;  %s969_s7 = inlined_call_operand.vmem [shape: bf16[32,32], index: 7, kind: input, shape index: {}]   ;;  %s970_s8 = inlined_call_operand.vmem [shape: f32[1,32], index: 8, kind: input, shape index: {}]   ;;  %s971_s9 = inlined_call_operand.vmem [shape: f32[1,32], index: 9, kind: input, shape index: {}]   ;;  %s972_s10 = inlined_call_operand.<no memory space> [shape: f32[1,1], index: 10, kind: input, shape index: {}]   ;;  %s973_s11 = inlined_call_operand.hbm [shape: f32[4,8], index: 11, kind: output, shape index: {0}]   ;;  %s974_s12 = inlined_call_operand.hbm [shape: f32[4,8,64], index: 12, kind: output, shape index: {1}]  }
   0x1   :  { %v18_v0 = vstv %s972_s10 }
   0x2   :  { %19 = vst [vmem:[#allocation3] sm:$0x1] %v18_v0 }
   0x3   :  { %20 = vsyncpa [#allocation5], 0  ;;  %v626_v1 = vld [vmem:[%s966_s4 + $0x8] sm:$0xff]  ;;  %v103_v2 = vlaneseq  ;;  %v625_v5 = vld [vmem:[%s966_s4] sm:$0xff]  ;;  %vm75_vm0 = vcmask 261120  }
   0x4   :  { %v628_v3 = vld [vmem:[%s969_s7 + $0x8] sm:$0xff]  ;;  %88 = vmatpush.bf16.msra.mxu0 %v626_v1  ;;  %v627_v6 = vld [vmem:[%s969_s7] sm:$0xff] }
   0x5   :  { %v104_v4 = vshrl.u32 %v103_v2, 7  ;;  %180 = vmatpush.bf16.msra.mxu1 %v628_v3  ;;  %v623_v7 = vld [vmem:[%s962_s0] sm:$0xff]  ;;  %202 = vmatpush.bf16.msra.mxu2 %v628_v3 }
   0x6   :  { %v256_v8 = vld [vmem:[%s964_s2] sm:$0xf]  ;;  %224 = vmatpush.bf16.msra.mxu3 %v628_v3 }
   0x7   :  { %637 = vset.pattern.permute.xlu2 %v104_v4  ;;  %635 = vset.pattern.permute.xlu0 %v104_v4  ;;  %v101_v9 = vld [vmem:[%s963_s1] sm:$0xf] }
   0x8   :  { %636 = vset.pattern.permute.xlu1 %v104_v4  ;;  %89 = vmatpush.bf16.msra.mxu0 %v625_v5 }
   0x9   :  { %181 = vmatpush.bf16.msra.mxu1 %v627_v6 }
   0xa   :  { %21 = vsyncpa [#allocation7], 0  ;;  %203 = vmatpush.bf16.msra.mxu2 %v627_v6  ;;  %225 = vmatpush.bf16.msra.mxu3 %v627_v6  ;;  %v257_v10 = vperm.slane %v256_v8, 0  ;;  %v102_v11 = vperm.slane %v101_v9, 0  ;;  %v736_v12 = vmov 0   ;;  %v116_v13 = vperm.slane %v101_v9, 2 }
   0xb   :  { %602 = vmatmul.msk.bf16.vlgmr.msra.gmra.mxu0 %vm75_vm0, %v623_v7  ;;  %v109_v14 = vperm.slane %v101_v9, 1  ;;  %v264_v15 = vperm.slane %v256_v8, 1  ;;  %v123_v16 = vperm.slane %v101_v9, 3  ;;  %v271_v17 = vperm.slane %v256_v8, 2  ;;  %v293_v19 = vld [vmem:[%s965_s3] sm:$0xff]  ;;  %v294_v25 = vld [vmem:[%s965_s3 + $0x8] sm:$0xff] }
   0xc   :  { %182 = vmatmul.bf16.vlgmr.msra.gmra.mxu1 %v736_v12  ;;  %v278_v18 = vperm.slane %v256_v8, 3  ;;  %v639_v20 = vld [vmem:[%s971_s9] ss:$0 sm:$0xff]  ;;  %s737_s21 = smov 32   ;;  %v295_v43 = vld [vmem:[%s965_s3 + $0x10] sm:$0xff]  ;;  %v296_v45 = vld [vmem:[%s965_s3 + $0x18] sm:$0xff] }
   0xd   :  { %246 = vmatpush.bf16.msrb.mxu1 %v628_v3  ;;  %v640_v30 = vld [vmem:[%s967_s5] ss:$0 sm:$0xff]  ;;  %v624_v8 = vld [vmem:[%s962_s0 + $0x8] sm:$0xff]  ;;  %vm547_vm4 = vcmask 523264   ;;  %s738_s0 = smov [#allocation4]   ;;  %s559_s30 = sshll.u32 %s973_s11, 4  ;;  %s560_s30 = int_to_ptr.hbm [resolvable:$true] %s559_s30 }
   0xe   :  { %v856_v35 = vld [vmem:[%s968_s6] ss:$0 sm:$0xff]  ;;  %s739_s11 = smov [#allocation6]   ;;  %s569_s16 = sshll.u32 %s974_s12, 4  ;;  %s570_s16 = int_to_ptr.hbm [resolvable:$true] %s569_s16 }
   0xf   :  { %262 = vperm.xlu2 %637, %v257_v10   ;;  %107 = vperm.xlu0 %635, %v102_v11   ;;  %v889_v62 = vld [vmem:[%s970_s8] ss:$0 sm:$0xff]  ;;  %s557_s8 = sshll.u32 %s738_s0, 4  ;;  %s567_s13 = sshll.u32 %s739_s11, 4  ;;  %s558_s8 = int_to_ptr.vmem [resolvable:$true] %s557_s8  ;;  %s568_s13 = int_to_ptr.vmem [resolvable:$true] %s567_s13 }
  0x10   :  { %121 = vperm.xlu1 %636, %v116_v13   ;;  %s740_s17 = smov 128   ;;  %s741_s1 = smov 8  }
  0x11   :  { %247 = vmatpush.bf16.msrb.mxu1 %v627_v6 }
  0x17   :  { %114 = vperm.xlu0 %635, %v109_v14   ;;  %269 = vperm.xlu2 %637, %v264_v15  }
  0x18   :  { %128 = vperm.xlu1 %636, %v123_v16  }
  0x1b   :  { %603 = vmatmul.msk.bf16.gmra.mxu0 %vm75_vm0, %v624_v8 }
  0x1f   :  { %276 = vperm.xlu0 %635, %v271_v17  }
  0x20   :  { %283 = vperm.xlu1 %636, %v278_v18  }
  0x27   :  { %638 = vset.pattern.permute.xlu0 %v736_v12 }
  0x69   :  { %v263_v21 = vpop.permute.xlu2 %262 }
  0x6a   :  { %v297_v22 = vmul.f32 %v293_v19, %v263_v21 }
  0x6c   :  { %v325_v23 = vmul.f32 %v639_v20, %v297_v22 }
  0x6e   :  { %v329_v24 = vsel %vm75_vm0, %v325_v23, 0.0 }
  0x6f   :  { %330 = vadd.xlane.f32.xlu1 %v329_v24 }
  0x71   :  { %v843_v26 = vpop.permute.xlu2 %269 }
  0x72   :  { %v298_v27 = vmul.f32 %v294_v25, %v843_v26 }
  0x74   :  { %v326_v28 = vmul.f32 %v639_v20, %v298_v27 }
  0x76   :  { %v332_v29 = vsel %vm75_vm0, %v326_v28, 0.0 }
  0x77   :  { %333 = vadd.xlane.f32.xlu2 %v332_v29 }
  0x81   :  { %v108_v31 = vpop.permute.xlu0 %107 }
  0x82   :  { %v122_v32 = vpop.permute.xlu1 %121  ;;  %v134_v34 = vmul.f32 %v640_v30, %v108_v31 }
  0x83   :  { %v850_v33 = vmul.f32 %v640_v30, %v122_v32 }
  0x88   :  { %455 = vrot.lane.b32.xlu1 %v297_v22, %s737_s21  ;;  %v91_v37 = vpop.f32.mrf.mxu0 }
  0x89   :  { %v115_v36 = vpop.permute.xlu0 %114  ;;  %v138_v38 = vadd.f32 %v134_v34, %v91_v37  ;;  %v183_v39 = vpop.f32.mrf.mxu1 }
  0x8a   :  { %v129_v40 = vpop.permute.xlu1 %128  ;;  %v135_v44 = vmul.f32 %v640_v30, %v115_v36 }
  0x8b   :  { %v858_v41 = vmul.f32 %v640_v30, %v129_v40  ;;  %v146_v42 = vadd.f32 %v856_v35, %v138_v38 }
  0x8d   :  { %150 = vst.msk [vmem:[#allocation2] sm:$0xff] %vm75_vm0, %v146_v42 }
  0x90   :  { %v93_v47 = vpop.f32.mrf.mxu0 }
  0x91   :  { %v868_v46 = vpop.permute.xlu0 %276  ;;  %v139_v49 = vadd.f32 %v135_v44, %v93_v47  ;;  %v185_v50 = vpop.f32.mrf.mxu1  ;;  %v643_v47 = vld [vmem:[#allocation3] ss:$0 sm:$0xff] }
  0x92   :  { %v871_v48 = vmul.f32 %v295_v43, %v868_v46  ;;  %v873_v51 = vpop.permute.xlu1 %283 }
  0x93   :  { %v876_v52 = vmul.f32 %v296_v45, %v873_v51  ;;  %v147_v53 = vadd.f32 %v856_v35, %v139_v49 }
  0x94   :  { %v327_v54 = vmul.f32 %v639_v20, %v871_v48  ;;  %v158_v55 = vld [vmem:[#allocation2] sm:$0xff] }
  0x95   :  { %v328_v56 = vmul.f32 %v639_v20, %v876_v52  ;;  %v187_v57 = vadd.f32 %v183_v39, %v158_v55  ;;  %151 = vst.msk [vmem:[#allocation2 + $0x8] sm:$0xff] %vm75_vm0, %v147_v53 }
  0x96   :  { %v335_v58 = vsel %vm75_vm0, %v327_v54, 0.0 }
  0x97   :  { %336 = vadd.xlane.f32.xlu0 %v335_v58  ;;  %v338_v59 = vsel %vm75_vm0, %v328_v56, 0.0  ;;  %644 = vtanh.f32 %v187_v57 }
  0x98   :  { %339 = vadd.xlane.f32.xlu2 %v338_v59  ;;  %v96_v58 = vpop.f32.mrf.mxu0 }
  0x99   :  { %v140_v59 = vadd.f32 %v850_v33, %v96_v58 }
  0x9c   :  { %v192_v25 = vld [vmem:[#allocation2 + $0x8] sm:$0xff] }
  0x9d   :  { %v645_v60 = vpop.eup %644 }
  0x9e   :  { %189 = vst.msk [vmem:[#allocation2] sm:$0xff] %vm75_vm0, %v645_v60  ;;  %v190_v61 = vpack.c.bf16 %v645_v60, %v645_v60  ;;  %v148_v60 = vadd.f32 %v856_v35, %v140_v59 }
  0xa0   :  { %612 = vmatmul.msk.bf16.vlgmr.msra.gmra.mxu2 %vm75_vm0, %v190_v61  ;;  %152 = vst.msk [vmem:[#allocation2 + $0x10] sm:$0xff] %vm75_vm0, %v148_v60  ;;  %v98_v61 = vpop.f32.mrf.mxu0 }
  0xa5   :  { %v285_v63 = vld [vmem:[#allocation2] sm:$0xff] }
  0xa6   :  { %v289_v0 = vmul.f32 %v285_v63, %v263_v21  ;;  %v141_v63 = vadd.f32 %v858_v41, %v98_v61 }
  0xa8   :  { %v305_v1 = vmul.f32 %v889_v62, %v289_v0 }
  0xaa   :  { %v309_v3 = vsel %vm75_vm0, %v305_v1, 0.0 }
  0xab   :  { %310 = vadd.xlane.f32.xlu2 %v309_v3  ;;  %v214_v3 = vld [vmem:[#allocation2 + $0x10] sm:$0xff] }
  0xc3   :  { %457 = vrot.lane.b32.xlu2 %v298_v27, %s737_s21 }
  0xe2   :  { %v331_v4 = vpop.xlane.xlu1 %330 }
  0xea   :  { %v899_v11 = vpop.xlane.xlu2 %333 }
  0xfa   :  { %v456_v5 = vpop.permute.xlu1 %455 }
  0xfb   :  { %v467_v6 = vsel %vm75_vm0, %v289_v0, %v456_v5  ;;  %v149_v0 = vadd.f32 %v856_v35, %v141_v63 }
  0xfc   :  { %v619_v7 = vmul.f32 -1.442695, %v467_v6 }
  0xfd   :  { %153 = vst.msk [vmem:[#allocation2 + $0x18] sm:$0xff] %vm75_vm0, %v149_v0 }
  0xfe   :  { %646 = vpow2.f32 %v619_v7 }
 0x104   :  { %v647_v9 = vpop.eup %646 }
 0x105   :  { %v483_v10 = vadd.f32 1.0, %v647_v9 }
 0x107   :  { %648 = vrcp.f32 %v483_v10  ;;  %v498_v15 = vand.u32 2147483648, %v483_v10  ;;  %v496_v17 = vand.u32 2147483647, %v483_v10  ;;  %vm492_vm2 = vweird.f32 %v483_v10 }
 0x109   :  { %v499_v19 = vor.u32 1.1754944e-38, %v498_v15  ;;  %vm497_vm5 = vcmp.eq.f32.partialorder %v496_v17, 8.507059e+37 }
 0x10a   :  { %v917_v1 = vpop.xlane.xlu0 %336 }
 0x10b   :  { %v901_v20 = vpop.xlane.xlu2 %339 }
 0x10d   :  { %v649_v12 = vpop.eup %648 }
 0x10e   :  { %v488_v13 = vmul.f32 %v649_v12, %v483_v10  ;;  %vm493_vm1 = vweird.f32 %v649_v12 }
 0x10f   :  { %vm494_vm3 = vmor %vm492_vm2, %vm493_vm1 }
 0x110   :  { %v489_v14 = vsub.f32 1.0, %v488_v13 }
 0x112   :  { %v490_v16 = vmul.f32 %v649_v12, %v489_v14 }
 0x114   :  { %v491_v18 = vadd.f32 %v649_v12, %v490_v16 }
 0x116   :  { %v495_v21 = vsel %vm494_vm3, %v649_v12, %v491_v18  ;;  %vm442_vm3 = vcmask 1041409  }
 0x117   :  { %v500_v22 = vsel %vm497_vm5, %v499_v19, %v495_v21 }
 0x118   :  { %548 = vst.msk [vmem:[#allocation6] sm:$0xff] %vm547_vm4, %v500_v22 }
 0x11e   :  { %v311_v23 = vpop.xlane.xlu2 %310 }
 0x11f   :  { %v341_v24 = vadd.f32 %v331_v4, %v311_v23 }
 0x123   :  { %v205_v27 = vpop.f32.mrf.mxu2 }
 0x124   :  { %v209_v28 = vadd.f32 %v205_v27, %v192_v25 }
 0x126   :  { %650 = vtanh.f32 %v209_v28  ;;  %v458_v32 = vpop.permute.xlu2 %457 }
 0x12b   :  { %v207_v29 = vpop.f32.mrf.mxu2 }
 0x12c   :  { %v651_v30 = vpop.eup %650 }
 0x12d   :  { %211 = vst.msk [vmem:[#allocation2 + $0x8] sm:$0xff] %vm75_vm0, %v651_v30  ;;  %v212_v31 = vpack.c.bf16 %v651_v30, %v651_v30 }
 0x12f   :  { %613 = vmatmul.msk.bf16.vlgmr.msra.gmra.mxu3 %vm75_vm0, %v212_v31 }
 0x134   :  { %v286_v34 = vld [vmem:[#allocation2 + $0x8] sm:$0xff] }
 0x135   :  { %v290_v36 = vmul.f32 %v286_v34, %v843_v26 }
 0x137   :  { %v468_v37 = vsel %vm75_vm0, %v290_v36, %v458_v32  ;;  %v306_v38 = vmul.f32 %v889_v62, %v290_v36  ;;  %v933_v36 = vand.u32 127, %v103_v2 }
 0x138   :  { %v620_v39 = vmul.f32 -1.442695, %v468_v37 }
 0x139   :  { %v312_v40 = vsel %vm75_vm0, %v306_v38, 0.0 }
 0x13a   :  { %652 = vpow2.f32 %v620_v39  ;;  %313 = vadd.xlane.f32.xlu0 %v312_v40 }
 0x140   :  { %v653_v42 = vpop.eup %652 }
 0x141   :  { %v484_v43 = vadd.f32 1.0, %v653_v42 }
 0x143   :  { %654 = vrcp.f32 %v484_v43  ;;  %v513_v50 = vand.u32 2147483648, %v484_v43  ;;  %v511_v26 = vand.u32 2147483647, %v484_v43  ;;  %vm507_vm7 = vweird.f32 %v484_v43 }
 0x145   :  { %v514_v55 = vor.u32 1.1754944e-38, %v513_v50  ;;  %vm512_vm9 = vcmp.eq.f32.partialorder %v511_v26, 8.507059e+37  ;;  %v236_v50 = vld [vmem:[#allocation2 + $0x18] sm:$0xff] }
 0x149   :  { %v655_v44 = vpop.eup %654 }
 0x14a   :  { %v503_v45 = vmul.f32 %v655_v44, %v484_v43  ;;  %vm508_vm6 = vweird.f32 %v655_v44 }
 0x14b   :  { %vm509_vm8 = vmor %vm507_vm7, %vm508_vm6 }
 0x14c   :  { %v504_v49 = vsub.f32 1.0, %v503_v45 }
 0x14e   :  { %v505_v53 = vmul.f32 %v655_v44, %v504_v49  ;;  %349 = vperm.xlu0 %638, %v643_v47  }
 0x150   :  { %v506_v54 = vadd.f32 %v655_v44, %v505_v53 }
 0x152   :  { %v510_v56 = vsel %vm509_vm8, %v655_v44, %v506_v54 }
 0x153   :  { %v515_v57 = vsel %vm512_vm9, %v514_v55, %v510_v56  ;;  %vm444_vm9 = vcmask 1042434  }
 0x154   :  { %549 = vst.msk [vmem:[#allocation6 + $0x8] sm:$0xff] %vm547_vm4, %v515_v57 }
 0x1ad   :  { %v314_v6 = vpop.xlane.xlu0 %313 }
 0x1ae   :  { %v342_v41 = vadd.f32 %v899_v11, %v314_v6 }
 0x1b2   :  { %v227_v4 = vpop.f32.mrf.mxu3 }
 0x1b3   :  { %v231_v5 = vadd.f32 %v227_v4, %v214_v3 }
 0x1b5   :  { %656 = vtanh.f32 %v231_v5 }
 0x1ba   :  { %v229_v7 = vpop.f32.mrf.mxu3 }
 0x1bb   :  { %v657_v33 = vpop.eup %656 }
 0x1bc   :  { %233 = vst.msk [vmem:[#allocation2 + $0x10] sm:$0xff] %vm75_vm0, %v657_v33  ;;  %v234_v8 = vpack.c.bf16 %v657_v33, %v657_v33 }
 0x1be   :  { %614 = vmatmul.msk.bf16.vlgmr.msrb.gmra.mxu1 %vm75_vm0, %v234_v8 }
 0x1c0   :  { %v922_v9 = vpop.permute.xlu0 %349 }
 0x1c1   :  { %v352_v35 = vadd.f32 %v922_v9, %v341_v24  ;;  %v353_v10 = vadd.f32 %v922_v9, %v342_v41 }
 0x1c3   :  { %v615_v12 = vmul.f32 -1.442695, %v352_v35  ;;  %v616_v13 = vmul.f32 -1.442695, %v353_v10  ;;  %v287_v14 = vld [vmem:[#allocation2 + $0x10] sm:$0xff] }
 0x1c4   :  { %v927_v15 = vmul.f32 %v287_v14, %v868_v46 }
 0x1c5   :  { %658 = vpow2.f32 %v615_v12 }
 0x1c6   :  { %660 = vpow2.f32 %v616_v13  ;;  %v307_v16 = vmul.f32 %v889_v62, %v927_v15 }
 0x1c8   :  { %v315_v17 = vsel %vm75_vm0, %v307_v16, 0.0 }
 0x1c9   :  { %316 = vadd.xlane.f32.xlu2 %v315_v17 }
 0x1cb   :  { %v659_v11 = vpop.eup %658 }
 0x1cc   :  { %v661_v18 = vpop.eup %660  ;;  %v368_v19 = vadd.f32 1.0, %v659_v11 }
 0x1cd   :  { %v369_v21 = vadd.f32 1.0, %v661_v18 }
 0x1ce   :  { %662 = vrcp.f32 %v368_v19  ;;  %v383_v28 = vand.u32 2147483648, %v368_v19  ;;  %v381_v30 = vand.u32 2147483647, %v368_v19  ;;  %vm377_vm12 = vweird.f32 %v368_v19 }
 0x1cf   :  { %664 = vrcp.f32 %v369_v21  ;;  %v398_v31 = vand.u32 2147483648, %v369_v21  ;;  %v396_v34 = vand.u32 2147483647, %v369_v21  ;;  %vm392_vm14 = vweird.f32 %v369_v21 }
 0x1d0   :  { %v384_v38 = vor.u32 1.1754944e-38, %v383_v28  ;;  %vm382_vm15 = vcmp.eq.f32.partialorder %v381_v30, 8.507059e+37 }
 0x1d1   :  { %v399_v42 = vor.u32 1.1754944e-38, %v398_v31  ;;  %vm397_vm2 = vcmp.eq.f32.partialorder %v396_v34, 8.507059e+37 }
 0x1d4   :  { %v663_v22 = vpop.eup %662 }
 0x1d5   :  { %v665_v23 = vpop.eup %664  ;;  %v373_v24 = vmul.f32 %v663_v22, %v368_v19  ;;  %vm378_vm10 = vweird.f32 %v663_v22 }
 0x1d6   :  { %v388_v25 = vmul.f32 %v665_v23, %v369_v21  ;;  %vm393_vm11 = vweird.f32 %v665_v23  ;;  %vm379_vm13 = vmor %vm377_vm12, %vm378_vm10 }
 0x1d7   :  { %v374_v46 = vsub.f32 1.0, %v373_v24  ;;  %vm394_vm1 = vmor %vm392_vm14, %vm393_vm11 }
 0x1d8   :  { %v389_v27 = vsub.f32 1.0, %v388_v25 }
 0x1d9   :  { %v375_v29 = vmul.f32 %v663_v22, %v374_v46 }
 0x1da   :  { %v390_v32 = vmul.f32 %v665_v23, %v389_v27 }
 0x1db   :  { %v376_v37 = vadd.f32 %v663_v22, %v375_v29 }
 0x1dc   :  { %v391_v39 = vadd.f32 %v665_v23, %v390_v32 }
 0x1dd   :  { %v380_v40 = vsel %vm379_vm13, %v663_v22, %v376_v37 }
 0x1de   :  { %v385_v43 = vsel %vm382_vm15, %v384_v38, %v380_v40  ;;  %v395_v44 = vsel %vm394_vm1, %v665_v23, %v391_v39 }
 0x1df   :  { %v400_v45 = vsel %vm397_vm2, %v399_v42, %v395_v44  ;;  %v438_v47 = vperm.slane %v385_v43, %v933_v36 }
 0x1e0   :  { %v439_v2 = vperm.slane %v400_v45, %v933_v36 }
 0x1e1   :  { %461 = vrot.lane.b32.xlu2 %v876_v52, %s737_s21 }
 0x1e2   :  { %v443_v49 = vsel %vm442_vm3, %v439_v2, %v438_v47  ;;  %vm449_vm3 = vcmask 60416  }
 0x23b   :  { %v249_v53 = vpop.f32.mrf.mxu1 }
 0x23c   :  { %v253_v26 = vadd.f32 %v249_v53, %v236_v50  ;;  %v317_v54 = vpop.xlane.xlu2 %316 }
 0x23d   :  { %v343_v55 = vadd.f32 %v917_v1, %v317_v54 }
 0x23e   :  { %666 = vtanh.f32 %v253_v26 }
 0x23f   :  { %v354_v56 = vadd.f32 %v922_v9, %v343_v55 }
 0x241   :  { %v617_v57 = vmul.f32 -1.442695, %v354_v56 }
 0x243   :  { %668 = vpow2.f32 %v617_v57  ;;  %v251_v58 = vpop.f32.mrf.mxu1 }
 0x244   :  { %v667_v59 = vpop.eup %666  ;;  %v462_v0 = vpop.permute.xlu2 %461 }
 0x245   :  { %255 = vst.msk [vmem:[#allocation2 + $0x18] sm:$0xff] %vm75_vm0, %v667_v59 }
 0x249   :  { %v669_v60 = vpop.eup %668 }
 0x24a   :  { %v370_v61 = vadd.f32 1.0, %v669_v60 }
 0x24c   :  { %670 = vrcp.f32 %v370_v61  ;;  %v288_v52 = vld [vmem:[#allocation2 + $0x18] sm:$0xff]  ;;  %v413_v41 = vand.u32 2147483648, %v370_v61  ;;  %v411_v10 = vand.u32 2147483647, %v370_v61  ;;  %vm407_vm6 = vweird.f32 %v370_v61 }
 0x24d   :  { %v292_v63 = vmul.f32 %v288_v52, %v873_v51 }
 0x24e   :  { %v414_v13 = vor.u32 1.1754944e-38, %v413_v41  ;;  %vm412_vm8 = vcmp.eq.f32.partialorder %v411_v10, 8.507059e+37 }
 0x24f   :  { %v470_v3 = vsel %vm75_vm0, %v292_v63, %v462_v0  ;;  %v308_v1 = vmul.f32 %v889_v62, %v292_v63 }
 0x250   :  { %v622_v4 = vmul.f32 -1.442695, %v470_v3 }
 0x251   :  { %v318_v5 = vsel %vm75_vm0, %v308_v1, 0.0 }
 0x252   :  { %v671_v6 = vpop.eup %670  ;;  %672 = vpow2.f32 %v622_v4  ;;  %319 = vadd.xlane.f32.xlu1 %v318_v5 }
 0x253   :  { %v403_v7 = vmul.f32 %v671_v6, %v370_v61  ;;  %vm408_vm5 = vweird.f32 %v671_v6 }
 0x254   :  { %vm409_vm7 = vmor %vm407_vm6, %vm408_vm5 }
 0x255   :  { %v404_v33 = vsub.f32 1.0, %v403_v7 }
 0x257   :  { %v405_v8 = vmul.f32 %v671_v6, %v404_v33 }
 0x258   :  { %v673_v35 = vpop.eup %672 }
 0x259   :  { %v486_v12 = vadd.f32 1.0, %v673_v35  ;;  %v406_v51 = vadd.f32 %v671_v6, %v405_v8 }
 0x25b   :  { %674 = vrcp.f32 %v486_v12  ;;  %v410_v62 = vsel %vm409_vm7, %v671_v6, %v406_v51  ;;  %v543_v21 = vand.u32 2147483648, %v486_v12  ;;  %v541_v23 = vand.u32 2147483647, %v486_v12 }
 0x25c   :  { %v415_v14 = vsel %vm412_vm8, %v414_v13, %v410_v62  ;;  %vm537_vm11 = vweird.f32 %v486_v12 }
 0x25d   :  { %v440_v16 = vperm.slane %v415_v14, %v933_v36  ;;  %v544_v25 = vor.u32 1.1754944e-38, %v543_v21  ;;  %vm542_vm13 = vcmp.eq.f32.partialorder %v541_v23, 8.507059e+37 }
 0x25f   :  { %v445_v17 = vsel %vm444_vm9, %v440_v16, %v443_v49 }
 0x261   :  { %v675_v11 = vpop.eup %674 }
 0x262   :  { %v533_v18 = vmul.f32 %v675_v11, %v486_v12  ;;  %vm538_vm10 = vweird.f32 %v675_v11 }
 0x263   :  { %vm539_vm12 = vmor %vm537_vm11, %vm538_vm10 }
 0x264   :  { %v534_v19 = vsub.f32 1.0, %v533_v18 }
 0x266   :  { %v535_v22 = vmul.f32 %v675_v11, %v534_v19 }
 0x268   :  { %v536_v24 = vadd.f32 %v675_v11, %v535_v22 }
 0x26a   :  { %v540_v46 = vsel %vm539_vm12, %v675_v11, %v536_v24 }
 0x26b   :  { %v545_v27 = vsel %vm542_vm13, %v544_v25, %v540_v46  ;;  %459 = vrot.lane.b32.xlu1 %v871_v48, %s737_s21 }
 0x26c   :  { %551 = vst.msk [vmem:[#allocation6 + $0x18] sm:$0xff] %vm547_vm4, %v545_v27 }
 0x2c5   :  { %v320_v28 = vpop.xlane.xlu1 %319 }
 0x2c6   :  { %v344_v29 = vadd.f32 %v901_v20, %v320_v28 }
 0x2c8   :  { %v355_v30 = vadd.f32 %v922_v9, %v344_v29 }
 0x2ca   :  { %v618_v31 = vmul.f32 -1.442695, %v355_v30 }
 0x2cc   :  { %676 = vpow2.f32 %v618_v31 }
 0x2d2   :  { %v677_v32 = vpop.eup %676 }
 0x2d3   :  { %v371_v34 = vadd.f32 1.0, %v677_v32 }
 0x2d5   :  { %678 = vrcp.f32 %v371_v34  ;;  %v428_v43 = vand.u32 2147483648, %v371_v34  ;;  %v426_v45 = vand.u32 2147483647, %v371_v34  ;;  %vm422_vm15 = vweird.f32 %v371_v34 }
 0x2d7   :  { %v429_v9 = vor.u32 1.1754944e-38, %v428_v43  ;;  %vm427_vm2 = vcmp.eq.f32.partialorder %v426_v45, 8.507059e+37 }
 0x2db   :  { %v679_v37 = vpop.eup %678 }
 0x2dc   :  { %v418_v38 = vmul.f32 %v679_v37, %v371_v34  ;;  %vm423_vm14 = vweird.f32 %v679_v37 }
 0x2dd   :  { %v460_v39 = vpop.permute.xlu1 %459  ;;  %vm424_vm1 = vmor %vm422_vm15, %vm423_vm14 }
 0x2de   :  { %v419_v40 = vsub.f32 1.0, %v418_v38  ;;  %v469_v42 = vsel %vm75_vm0, %v927_v15, %v460_v39  ;;  %vm446_vm0 = vcmask 1043459  }
 0x2df   :  { %v621_v48 = vmul.f32 -1.442695, %v469_v42 }
 0x2e0   :  { %v420_v44 = vmul.f32 %v679_v37, %v419_v40 }
 0x2e1   :  { %680 = vpow2.f32 %v621_v48 }
 0x2e2   :  { %v421_v20 = vadd.f32 %v679_v37, %v420_v44 }
 0x2e4   :  { %v425_v47 = vsel %vm424_vm1, %v679_v37, %v421_v20 }
 0x2e5   :  { %v430_v2 = vsel %vm427_vm2, %v429_v9, %v425_v47 }
 0x2e6   :  { %v441_v15 = vperm.slane %v430_v2, %v933_v36 }
 0x2e7   :  { %v681_v49 = vpop.eup %680 }
 0x2e8   :  { %v485_v50 = vadd.f32 1.0, %v681_v49  ;;  %v447_v53 = vsel %vm446_vm0, %v441_v15, %v445_v17 }
 0x2e9   :  { %450 = vst.msk [vmem:[#allocation4] sm:$0xf] %vm449_vm3, %v447_v53 }
 0x2ea   :  { %682 = vrcp.f32 %v485_v50  ;;  %562 = dma.vmem_to_hbm [thread:$0]  %s558_s8, 64, %s560_s30, [#allocation5]   ;;  %v528_v56 = vand.u32 2147483648, %v485_v50  ;;  %v526_v58 = vand.u32 2147483647, %v485_v50  ;;  %vm522_vm6 = vweird.f32 %v485_v50 }
 0x2ec   :  { %v529_v59 = vor.u32 1.1754944e-38, %v528_v56  ;;  %vm527_vm8 = vcmp.eq.f32.partialorder %v526_v58, 8.507059e+37 }
 0x2f0   :  { %v683_v26 = vpop.eup %682 }
 0x2f1   :  { %v518_v54 = vmul.f32 %v683_v26, %v485_v50  ;;  %vm523_vm5 = vweird.f32 %v683_v26 }
 0x2f2   :  { %vm524_vm7 = vmor %vm522_vm6, %vm523_vm5 }
 0x2f3   :  { %v519_v55 = vsub.f32 1.0, %v518_v54 }
 0x2f5   :  { %v520_v57 = vmul.f32 %v683_v26, %v519_v55 }
 0x2f7   :  { %v521_v36 = vadd.f32 %v683_v26, %v520_v57 }
 0x2f9   :  { %v525_v60 = vsel %vm524_vm7, %v683_v26, %v521_v36 }
 0x2fa   :  { %v530_v61 = vsel %vm527_vm8, %v529_v59, %v525_v60 }
 0x2fb   :  { %550 = vst.msk [vmem:[#allocation6 + $0x10] sm:$0xff] %vm547_vm4, %v530_v61 }
 0x2fc   :  { %575 = dma.vmem_to_hbm [thread:$0]  %s568_s13, 512, %s570_s16, [#allocation7], %s740_s17, %s740_s17, %s741_s1  }
 0x2fd   :  { %732 = dma.done.wait [#allocation5], 64  }
 0x2fe   :  { %733 = vsyncadd [#allocation5], 4294967232 }
 0x2ff   :  { %734 = dma.done.wait [#allocation7], 512  }
 0x300   :  { %735 = vsyncadd [#allocation7], 4294966784 }
 0x301   :  { %584 = vsyncpa [#allocation5], 1 }
 0x302   :  { %585 = vsyncpa [#allocation7], 1 }

</bundles_post_ra>
